<compile_context>
chip_gen: v5e
topology: v5e:2x2
jax: 0.10.0
libtpu: 0.0.40
codegen_flags: <defaults>
</compile_context>

<pallas_src>
import functools

import jax
import jax.numpy as jnp
from jax.experimental import pallas as pl
from jax.experimental.pallas import tpu as pltpu

MAX_S_TILE = 8192     # spatial tile cap (multiple of 128); blocks stay well under scoped VMEM
SMOOTH = 1e-10
EPS_NORM = 1e-8


def _spatial_tile(S, max_tile=MAX_S_TILE):
    # TODO(synk): spatial sizes that are not a multiple of 128 would need padding plus
    # masking of the dice / norm reductions; we assert instead.
    assert S % 128 == 0, "flattened spatial size D*H*W must be a multiple of 128"
    t = min(S, max_tile)
    t -= t % 128
    while S % t:
        t -= 128
    return t


def _softmax_cols(y):
    """Per-voxel (per-column) softmax over the class (sublane) axis."""
    m = jnp.max(y, axis=0, keepdims=True)          # XLU (cross-sublane), free slot
    e = jnp.exp(y - m)                              # EUP
    den = jnp.sum(e, axis=0, keepdims=True)
    inv = pl.reciprocal(den, approx=True)           # EUP slot (otherwise idle)
    inv = inv * (2.0 - den * inv)                    # one Newton step -> f32-accurate
    return e * inv


# ---------------------------------------------------------------------------
# Kernel 1: per-sample sum of squares (tiled; used only for the initial d0 norm)
# ---------------------------------------------------------------------------
def _sumsq_kernel(d_ref, ssq_ref, acc_ref):
    s = pl.program_id(1)

    @pl.when(s == 0)
    def _():
        acc_ref[...] = jnp.zeros_like(acc_ref)

    v = d_ref[0]                                                     # (C, St)
    acc_ref[...] += jnp.sum(jnp.sum(v * v, axis=1, keepdims=True),
                            axis=0, keepdims=True)

    @pl.when(s == pl.num_programs(1) - 1)
    def _():
        ssq_ref[0] = acc_ref[...]


def sumsq(d, s_tile):
    N, C, S = d.shape
    out = pl.pallas_call(
        _sumsq_kernel,
        out_shape=jax.ShapeDtypeStruct((N, 1, 1), jnp.float32),
        grid_spec=pltpu.PrefetchScalarGridSpec(
            num_scalar_prefetch=0,
            grid=(N, S // s_tile),
            in_specs=[pl.BlockSpec((1, C, s_tile), lambda n, s: (n, 0, s))],
            out_specs=pl.BlockSpec((1, 1, 1), lambda n, s: (n, 0, 0)),
            scratch_shapes=[pltpu.VMEM((1, 1), jnp.float32)],
        ),
        compiler_params=pltpu.CompilerParams(
            dimension_semantics=("parallel", "arbitrary")),
    )(d)
    return out[:, 0, 0]                                              # (N,)


# ---------------------------------------------------------------------------
# Kernel 2: fused perturb + conv + softmax (pred AND p_hat) + per-class dice sums
#   t = softmax(Wx + b)            (pred, recomputed in-kernel, never in HBM)
#   p = softmax(Wx + b + coef*Wd)  (p_hat)
#   out[n,k] = [sum p*t, sum p*p, sum t*t]
# ---------------------------------------------------------------------------
def _softmax_dice_kernel(x_ref, d_ref, coef_ref, w_ref, b_ref,
                         sums_ref, pt_acc, pp_acc, tt_acc):
    s = pl.program_id(1)

    @pl.when(s == 0)
    def _():
        pt_acc[...] = jnp.zeros_like(pt_acc)
        pp_acc[...] = jnp.zeros_like(pp_acc)
        tt_acc[...] = jnp.zeros_like(tt_acc)

    y0 = jnp.dot(w_ref[...], x_ref[0],
                 preferred_element_type=jnp.float32) + b_ref[...]    # (K, St)  Wx + b
    yd = jnp.dot(w_ref[...], d_ref[0],
                 preferred_element_type=jnp.float32)                 # (K, St)  Wd
    t = _softmax_cols(y0)                                            # pred
    p = _softmax_cols(y0 + coef_ref[0] * yd)                         # p_hat

    pt_acc[...] += jnp.sum(p * t, axis=1, keepdims=True)
    pp_acc[...] += jnp.sum(p * p, axis=1, keepdims=True)
    tt_acc[...] += jnp.sum(t * t, axis=1, keepdims=True)

    @pl.when(s == pl.num_programs(1) - 1)
    def _():
        sums_ref[0] = jnp.concatenate(
            [pt_acc[...], pp_acc[...], tt_acc[...]], axis=1)         # (K, 3), once/sample


def softmax_dice_sums(x, d, coef, w, b2, s_tile):
    N, C, S = x.shape
    K = w.shape[0]
    return pl.pallas_call(
        _softmax_dice_kernel,
        out_shape=jax.ShapeDtypeStruct((N, K, 3), jnp.float32),
        grid_spec=pltpu.PrefetchScalarGridSpec(
            num_scalar_prefetch=0,
            grid=(N, S // s_tile),
            in_specs=[
                pl.BlockSpec((1, C, s_tile), lambda n, s: (n, 0, s)),
                pl.BlockSpec((1, C, s_tile), lambda n, s: (n, 0, s)),
                pl.BlockSpec((1, 1, 1), lambda n, s: (n, 0, 0)),
                pl.BlockSpec((K, C), lambda n, s: (0, 0)),
                pl.BlockSpec((K, 1), lambda n, s: (0, 0)),
            ],
            out_specs=pl.BlockSpec((1, K, 3), lambda n, s: (n, 0, 0)),
            scratch_shapes=[pltpu.VMEM((K, 1), jnp.float32)] * 3,
        ),
        compiler_params=pltpu.CompilerParams(
            dimension_semantics=("parallel", "arbitrary")),
    )(x, d, coef, w, b2)


# ---------------------------------------------------------------------------
# Kernel 3: analytic gradient of DiceLoss(softmax(W(x+xi*d_n)+b), pred) wrt d_n
#   pred and p_hat are recomputed in-kernel (no HBM round-trip for either);
#   dL/dp_k = alpha_k*t_k + beta_k*p_k ; dL/dy = p*(dL/dp - <p,dL/dp>) ;
#   g = xi * W^T dL/dy ; also emits fused per-sample sum(g*g).
# ---------------------------------------------------------------------------
def _vat_grad_kernel(x_ref, d_ref, coef_ref, alpha_ref, beta_ref,
                     w_ref, b_ref, wt_ref, g_ref, ssq_ref, ssq_acc, *, xi):
    s = pl.program_id(1)

    @pl.when(s == 0)
    def _():
        ssq_acc[...] = jnp.zeros_like(ssq_acc)

    y0 = jnp.dot(w_ref[...], x_ref[0],
                 preferred_element_type=jnp.float32) + b_ref[...]    # (K, St)
    yd = jnp.dot(w_ref[...], d_ref[0],
                 preferred_element_type=jnp.float32)                 # (K, St)
    t = _softmax_cols(y0)                                            # pred (recomputed)
    p = _softmax_cols(y0 + coef_ref[0] * yd)                         # p_hat (recomputed)

    gp = alpha_ref[...] * t + beta_ref[...] * p                      # dL/dp   (K, St)
    inner = jnp.sum(p * gp, axis=0, keepdims=True)                   # (1, St)
    gy = p * (gp - inner)                                            # softmax VJP
    g = xi * jnp.dot(wt_ref[...], gy,
                     preferred_element_type=jnp.float32)             # (C, St)
    g_ref[0] = g
    ssq_acc[...] += jnp.sum(jnp.sum(g * g, axis=1, keepdims=True),
                            axis=0, keepdims=True)

    @pl.when(s == pl.num_programs(1) - 1)
    def _():
        ssq_ref[0] = ssq_acc[...]


def vat_grad(x, d, coef, alpha, beta, w, b2, wt, xi, s_tile):
    N, C, S = x.shape
    K = w.shape[0]
    kernel = functools.partial(_vat_grad_kernel, xi=float(xi))
    g, ssq = pl.pallas_call(
        kernel,
        out_shape=(jax.ShapeDtypeStruct((N, C, S), jnp.float32),
                   jax.ShapeDtypeStruct((N, 1, 1), jnp.float32)),
        grid_spec=pltpu.PrefetchScalarGridSpec(
            num_scalar_prefetch=0,
            grid=(N, S // s_tile),
            in_specs=[
                pl.BlockSpec((1, C, s_tile), lambda n, s: (n, 0, s)),
                pl.BlockSpec((1, C, s_tile), lambda n, s: (n, 0, s)),
                pl.BlockSpec((1, 1, 1), lambda n, s: (n, 0, 0)),
                pl.BlockSpec((K, 1), lambda n, s: (0, 0)),
                pl.BlockSpec((K, 1), lambda n, s: (0, 0)),
                pl.BlockSpec((K, C), lambda n, s: (0, 0)),
                pl.BlockSpec((K, 1), lambda n, s: (0, 0)),
                pl.BlockSpec((C, K), lambda n, s: (0, 0)),
            ],
            out_specs=(pl.BlockSpec((1, C, s_tile), lambda n, s: (n, 0, s)),
                       pl.BlockSpec((1, 1, 1), lambda n, s: (n, 0, 0))),
            scratch_shapes=[pltpu.VMEM((1, 1), jnp.float32)],
        ),
        compiler_params=pltpu.CompilerParams(
            dimension_semantics=("parallel", "arbitrary")),
    )(x, d, coef, alpha, beta, w, b2, wt)
    return g, ssq[:, 0, 0]


# ---------------------------------------------------------------------------
# VAT3d forward (equivalent of VAT3d.forward(model, x) with the synthetic model)
# ---------------------------------------------------------------------------
def _dice_inter_union(sums_nk3):
    sums = jnp.sum(sums_nk3, axis=0)                 # (K, 3) over the batch
    inter = 2.0 * sums[:, 0] + SMOOTH
    union = sums[:, 1] + sums[:, 2] + SMOOTH
    return inter, union


def vat3d_forward(x, d_init, w, b, *, xi=10.0, epi=6.0, ip=1, s_tile=None):
    N, C, S = x.shape
    K = w.shape[0]
    if s_tile is None:
        s_tile = _spatial_tile(S)
    assert S % s_tile == 0 and s_tile % 128 == 0

    w = w.astype(jnp.float32)
    b2 = b.reshape(K, 1).astype(jnp.float32)
    wt = jnp.transpose(w)                            # (C, K)

    # pred = softmax(model(x)) under torch.no_grad(): deterministic function of x,
    # recomputed inside every consuming kernel instead of being stored in HBM.
    # TODO(synk): _disable_tracking_bn_stats is a no-op — synthetic 1x1x1-conv model has no BatchNorm.

    d_raw = d_init                                   # un-normalised direction
    ssq = sumsq(d_init, s_tile)                      # per-sample ||d||^2

    for _ in range(ip):
        # coef_n = xi / (||d_n|| + eps): applied in-kernel, so the normalised d
        # (and the perturbed input) never round-trip through HBM.
        coef = (xi / (jnp.sqrt(ssq) + EPS_NORM)).reshape(N, 1, 1).astype(jnp.float32)
        inter, union = _dice_inter_union(
            softmax_dice_sums(x, d_raw, coef, w, b2, s_tile))
        # dL/dp_k = (-2*t_k/union_k + 2*inter_k*p_k/union_k^2) / n_classes
        alpha = (-2.0 / union / K).reshape(K, 1).astype(jnp.float32)
        beta = (2.0 * inter / (union * union) / K).reshape(K, 1).astype(jnp.float32)
        # autograd .backward() replaced by analytic VJP (recomputes pred & p_hat in-kernel)
        d_raw, ssq = vat_grad(x, d_raw, coef, alpha, beta, w, b2, wt, xi, s_tile)

    coef = (epi / (jnp.sqrt(ssq) + EPS_NORM)).reshape(N, 1, 1).astype(jnp.float32)
    inter, union = _dice_inter_union(
        softmax_dice_sums(x, d_raw, coef, w, b2, s_tile))
    return jnp.mean(1.0 - inter / union)


# ---------------------------------------------------------------------------
# Pure-JAX reference (uses jax.grad) for correctness checking
# ---------------------------------------------------------------------------
def _ref_model(x, w, b):
    return jnp.einsum('kc,ncs->nks', w, x) + b[None, :, None]


def _ref_dice(p, t):
    K = p.shape[1]
    loss = 0.0
    for i in range(K):
        inter = 2.0 * jnp.sum(p[:, i] * t[:, i]) + SMOOTH
        union = jnp.sum(p[:, i] ** 2) + jnp.sum(t[:, i] ** 2) + SMOOTH
        loss = loss + (1.0 - inter / union)
    return loss / K


def _ref_l2n(d):
    n = jnp.sqrt(jnp.sum(d * d, axis=(1, 2), keepdims=True))
    return d / (n + EPS_NORM)


def _ref_vat(x, d0, w, b, xi, epi, ip):
    pred = jax.nn.softmax(_ref_model(x, w, b), axis=1)
    d = _ref_l2n(d0)
    for _ in range(ip):
        def adv(dd):
            p_hat = jax.nn.softmax(_ref_model(x + xi * dd, w, b), axis=1)
            return _ref_dice(p_hat, pred)
        g = jax.grad(adv)(d)
        d = _ref_l2n(g)
    p_hat = jax.nn.softmax(_ref_model(x + epi * d, w, b), axis=1)
    return _ref_dice(p_hat, pred)


if __name__ == "__main__":
    key = jax.random.PRNGKey(0)
    N, C, D, H, Wsp = 2, 4, 8, 8, 8
    K = 4  # n_classes for the synthetic segmentation model
    k1, k2, k3, k4 = jax.random.split(key, 4)

    x5d = jax.random.normal(k1, (N, C, D, H, Wsp), jnp.float32)
    w = 0.5 * jax.random.normal(k2, (K, C), jnp.float32)     # 1x1x1 conv weight
    b = 0.1 * jax.random.normal(k3, (K,), jnp.float32)       # conv bias
    # torch.rand(x.shape).sub(0.5)
    d0_5d = jax.random.uniform(k4, (N, C, D, H, Wsp), jnp.float32) - 0.5

    S = D * H * Wsp
    x = x5d.reshape(N, C, S)
    d0 = d0_5d.reshape(N, C, S)

    ref = jax.block_until_ready(_ref_vat(x, d0, w, b, 10.0, 6.0, 1))

    # default (largest) spatial tile: one tile per sample at this toy size
    lds = jax.block_until_ready(vat3d_forward(x, d0, w, b, xi=10.0, epi=6.0, ip=1))
    assert jnp.allclose(lds, ref, rtol=1e-3, atol=1e-5), (float(lds), float(ref))

    # small tile: exercises the multi-step dice / sumsq accumulators
    lds_t = jax.block_until_ready(
        vat3d_forward(x, d0, w, b, xi=10.0, epi=6.0, ip=1, s_tile=128))
    assert jnp.allclose(lds_t, ref, rtol=1e-3, atol=1e-5), (float(lds_t), float(ref))

    print("KERNEL_OK")
</pallas_src>

<mosaic_0001>
module attributes {stable_mosaic.version = 11 : i64} {
  func.func @_sumsq_kernel(%arg0: i32, %arg1: i32, %arg2: memref<1x4x512xf32, #tpu.memory_space<vmem>>, %arg3: memref<1x1x1xf32, #tpu.memory_space<vmem>>, %arg4: memref<1x1xf32, #tpu.memory_space<vmem>>) attributes {dimension_semantics = [#tpu.dimension_semantics<parallel>, #tpu.dimension_semantics<arbitrary>], iteration_bounds = array<i64: 2, 1>, scalar_prefetch = 0 : i64, scratch_operands = 1 : i64, tpu.core_type = #tpu.core_type<tc>, window_params = [{transform_indices = @transform_0, window_bounds = array<i64: 1, 4, 512>}, {transform_indices = @transform_1, window_bounds = array<i64: 1, 1, 1>}]} {
    %c0_i32 = arith.constant 0 : i32
    %0 = arith.cmpi eq, %arg1, %c0_i32 : i32
    %1 = arith.extui %0 : i1 to i32
    %c0_i32_0 = arith.constant 0 : i32
    %2 = arith.cmpi ne, %1, %c0_i32_0 : i32
    scf.if %2 {
      %cst_10 = arith.constant 0.000000e+00 : f32
      %16 = vector.broadcast %cst_10 : f32 to vector<1x1xf32>
      %c0_11 = arith.constant 0 : index
      %c0_12 = arith.constant 0 : index
      %17 = vector.load %arg4[%c0_11, %c0_12] : memref<1x1xf32, #tpu.memory_space<vmem>>, vector<1x1xf32>
      tpu.vector_store %arg4[%c0_11, %c0_12], %16 {strides = array<i32>} : memref<1x1xf32, #tpu.memory_space<vmem>>, vector<1x1xf32>,
    } else {
    }
    %c0 = arith.constant 0 : index
    %c0_1 = arith.constant 0 : index
    %c0_2 = arith.constant 0 : index
    %3 = vector.load %arg2[%c0, %c0_1, %c0_2] : memref<1x4x512xf32, #tpu.memory_space<vmem>>, vector<1x4x512xf32>
    %4 = vector.shape_cast %3 : vector<1x4x512xf32> to vector<4x512xf32>
    %c0_3 = arith.constant 0 : index
    %c0_4 = arith.constant 0 : index
    %5 = vector.load %arg4[%c0_3, %c0_4] : memref<1x1xf32, #tpu.memory_space<vmem>>, vector<1x1xf32>
    %6 = arith.mulf %4, %4 : vector<4x512xf32>
    %cst = arith.constant dense<0.000000e+00> : vector<4xf32>
    %7 = vector.multi_reduction <add>, %6, %cst [1] : vector<4x512xf32> to vector<4xf32>
    %8 = vector.shape_cast %7 : vector<4xf32> to vector<4x1xf32>
    %cst_5 = arith.constant dense<0.000000e+00> : vector<1xf32>
    %9 = vector.multi_reduction <add>, %8, %cst_5 [0] : vector<4x1xf32> to vector<1xf32>
    %10 = vector.shape_cast %9 : vector<1xf32> to vector<1x1xf32>
    %11 = arith.addf %5, %10 : vector<1x1xf32>
    %c0_6 = arith.constant 0 : index
    %c0_7 = arith.constant 0 : index
    %12 = vector.load %arg4[%c0_6, %c0_7] : memref<1x1xf32, #tpu.memory_space<vmem>>, vector<1x1xf32>
    tpu.vector_store %arg4[%c0_6, %c0_7], %11 {strides = array<i32>} : memref<1x1xf32, #tpu.memory_space<vmem>>, vector<1x1xf32>,
    %c0_i32_8 = arith.constant 0 : i32
    %13 = arith.cmpi eq, %arg1, %c0_i32_8 : i32
    %14 = arith.extui %13 : i1 to i32
    %c0_i32_9 = arith.constant 0 : i32
    %15 = arith.cmpi ne, %14, %c0_i32_9 : i32
    scf.if %15 {
      %c0_10 = arith.constant 0 : index
      %c0_11 = arith.constant 0 : index
      %16 = vector.load %arg4[%c0_10, %c0_11] : memref<1x1xf32, #tpu.memory_space<vmem>>, vector<1x1xf32>
      %c0_12 = arith.constant 0 : index
      %c0_13 = arith.constant 0 : index
      %c0_14 = arith.constant 0 : index
      %17 = vector.load %arg3[%c0_12, %c0_13, %c0_14] : memref<1x1x1xf32, #tpu.memory_space<vmem>>, vector<1x1x1xf32>
      %18 = vector.shape_cast %17 : vector<1x1x1xf32> to vector<1x1xf32>
      %19 = vector.shape_cast %16 : vector<1x1xf32> to vector<1x1x1xf32>
      tpu.vector_store %arg3[%c0_12, %c0_13, %c0_14], %19 {strides = array<i32>} : memref<1x1x1xf32, #tpu.memory_space<vmem>>, vector<1x1x1xf32>,
    } else {
    }
    return
  }
  func.func @transform_0(%arg0: i32, %arg1: i32) -> (i32, i32, i32) {
    %c0_i32 = arith.constant 0 : i32
    %c0_i32_0 = arith.constant 0 : i32
    return %arg0, %c0_i32, %arg1 : i32, i32, i32
  }
  func.func @transform_1(%arg0: i32, %arg1: i32) -> (i32, i32, i32) {
    %c0_i32 = arith.constant 0 : i32
    %c0_i32_0 = arith.constant 0 : i32
    %c0_i32_1 = arith.constant 0 : i32
    return %arg0, %c0_i32, %c0_i32_0 : i32, i32, i32
  }
}

</mosaic_0001>

<bundles_post_ra>
// kernel: tpu_custom_call.1
= control target key start
LH: loop header
LB: loop body
LE: loop exit
PB: predicated region body
PF: predicated region fallthrough
CT: control target
= control target key end

     0   :  { %6 = vsyncpa [#allocation4], 0  ;;  %s521_s0 = inlined_call_operand.hbm [shape: f32[2,4,512], index: 0, kind: input, shape index: {}]   ;;  %s522_s1 = inlined_call_operand.vmem [shape: f32[2,1,1], index: 1, kind: output, shape index: {}]  }
   0x1   :  { %8 = vsyncpa [#allocation4 + $0x1], 0  ;;  %s430_s6 = smov 0   ;;  %s432_s7 = smov 0  }
   0x2   :  { %s434_s8 = smov 0   ;;  %s436_s9 = smov 0  }
   0x3   :  { %s438_s10 = smov 0   ;;  %s440_s11 = smov 0  }
   0x4 LB: > { %s269_s12 = sadd.s32 4294967295, %s417_s11   ;;  %s26_s13 = sadd.s32 1, %s413_s10  ;;  %s417_s11 = sphi %s440_s11, %s14_s11   ;;  %s413_s10 = sphi %s438_s10, %s529_s10   ;;  %s409_s9 = sphi %s436_s9, %s528_s9   ;;  %s405_s8 = sphi %s434_s8, %s527_s8   ;;  %s401_s7 = sphi %s432_s7, %s526_s7   ;;  %s397_s6 = sphi %s430_s6, %s525_s6  }
   0x5   : > { %p28_p0 = scmp.ge.s32.totalorder %s26_s13, 2  ;;  %s35_s14 = sadd.s32 1, %s405_s8 }
   0x6   : > { %p42_p1 = scmp.ne.s32.totalorder %s405_s8, %s401_s7  ;;  %p43_p2 = scmp.eq.s32.totalorder %s417_s11, 0 }
   0x7   : > { %s531_s13 = smov (%p28_p0, %s26_s13), 0  ;;  %p48_p4 = scmp.ne.s32.totalorder %s401_s7, %s397_s6 }
   0x8   : > { %p466_p3 = por %p43_p2, %p42_p1  ;;  %s30_s16 = ssub.s32 %s413_s10, %s531_s13 }
   0x9   : > { %p49_p5 = scmp.eq.s32.totalorder %s269_s12, 0  ;;  %p33_p6 = scmp.eq.s32.totalorder %s30_s16, 0 }
   0xa   : > { %p287_p8 = scmp.lt.s32.totalorder %s417_s11, 2  ;;  %s98_s19 = sand.u32 1, %s405_s8  }
   0xb   : > { %p473_p7 = por %p49_p5, %p48_p4  ;;  %s280_s20 = sshll.u32 %s413_s10, 4 }
   0xc   : > { %s479_s18 = scalar_select %p33_p6, %s405_s8, %s35_s14  }
   0xd   : > { %s273_s21 = sshll.u32 %s98_s19, 4  ;;  %s109_s24 = scalar_lea.hbm %s521_s0, %s280_s20 }
   0xe   : > { %s111_s25 = sshll.u32 %s109_s24, 4  ;;  %s102_s26 = scalar_lea.vmem [#allocation3], %s273_s21  ;;  %s112_s25 = int_to_ptr.hbm [resolvable:$true] %s111_s25 }
   0xf   : > { %s113_s27 = sshll.u32 %s102_s26, 4  ;;  %p284_p9 = pnand %p287_p8, %p466_p3  ;;  %s114_s27 = int_to_ptr.vmem [resolvable:$true] %s113_s27 }
  0x10   : > { %p276_p10 = scmp.ge.s32.totalorder %s417_s11, 1  ;;  %p118_p11 = scmp.lt.s32.totalorder %s417_s11, 3 }
  0x11   : > { %s99_s28 = scalar_lea.sflag [#allocation4], %s98_s19 }
  0x12   : > { %286 = dma.hbm_to_vmem [thread:$0]  (!%p284_p9), %s112_s25, 256, %s114_s27, %s99_s28  }
  0x13   : > { %p119_p12 = pnand %p276_p10, %p118_p11 }
  0x14   : > { %s124_s29 = sand.u32 (!%p119_p12), 1, %s401_s7  }
  0x15   : > { %122 = sbr.rel (%p119_p12) target bundleno = 186 (0xba), region = 24  ;;  %s277_s30 = sshll.u32 (!%p119_p12), %s124_s29, 4 }
  0x16   : > { %s125_s2 = scalar_lea.sflag (!%p119_p12), [#allocation4], %s124_s29  ;;  %s128_s3 = scalar_lea.vmem (!%p119_p12), [#allocation3], %s277_s30 }
  0x1a   : > { %392 = dma.done.wait (%p473_p7), %s125_s2, 256  }
  0x1b   : > { %394 = vsyncadd (%p473_p7), %s125_s2, 4294967040  ;;  %vm154_vm0 = vcmask 0   ;;  %v419_v0 = vmov 0.0   ;;  %v156_v1 = vld [vmem:[%s128_s3] sm:$0xff]  ;;  %v157_v2 = vld [vmem:[%s128_s3 + $0x8] sm:$0xff]  ;;  %vm174_vm1 = vcmask 1043456  }
  0x1c   : > { %155 = vst.msk [vmem:[#allocation2] sm:$0x1] %vm154_vm0, %v419_v0  ;;  %v159_v3 = vmul.f32 %v156_v1, %v156_v1  ;;  %v160_v4 = vmul.f32 %v157_v2, %v157_v2  ;;  %p147_p13 = scmp.lt.s32.totalorder %s409_s9, 1 }
  0x1e   : > { %163 = vst [vmem:[#allocation1] ss:$2 sm:$0xff] %v159_v3  ;;  %s533_s9 = smov (!%p147_p13, %s409_s9), 1 }
  0x1f   : > { %165 = vst [vmem:[#allocation1 + $0x10] ss:$2 sm:$0xff] %v160_v4  ;;  %s149_s6 = scalar_lea.vmem %s522_s1, %s533_s9 }
  0x23   : > { %v158_v23 = vld [vmem:[#allocation2] sm:$0x1] }
  0x25   : > { %v166_v5 = vld.sshfl [vmem:[#allocation1] sm:$0xff pattern:$0x75316420]  ;;  %v167_v6 = vld.sshfl [vmem:[#allocation1 + $0x8] sm:$0xff pattern:$0x75316420] }
  0x26   : > { %v168_v7 = vld.sshfl [vmem:[#allocation1 + $0x10] sm:$0xff pattern:$0x75316420]  ;;  %v169_v8 = vld.sshfl [vmem:[#allocation1 + $0x18] sm:$0xff pattern:$0x75316420] }
  0x27   : > { %v175_v9 = vsel %vm174_vm1, %v166_v5, 0.0  ;;  %v176_v10 = vsel %vm174_vm1, %v167_v6, 0.0  ;;  %v178_v11 = vsel %vm174_vm1, %v168_v7, 0.0  ;;  %v180_v13 = vsel %vm174_vm1, %v169_v8, 0.0 }
  0x28   : > { %v177_v12 = vadd.f32 %v176_v10, %v175_v9 }
  0x2a   : > { %v179_v14 = vadd.f32 %v178_v11, %v177_v12 }
  0x2c   : > { %v181_v15 = vadd.f32 %v180_v13, %v179_v14 }
  0x2e   : > { %182 = vadd.xlane.f32.xlu0 %v181_v15 }
  0xa1   : > { %v183_v16 = vpop.xlane.xlu0 %182 }
  0xa2   : > { %v184_v17 = vsel %vm174_vm1, %v183_v16, 0.0 }
  0xa3   : > { %v185_v18 = vrot.slane %v184_v17, 4 }
  0xa5   : > { %v186_v19 = vadd.f32 %v185_v18, %v184_v17 }
  0xa7   : > { %v187_v20 = vrot.slane %v186_v19, 2 }
  0xa9   : > { %v188_v21 = vadd.f32 %v187_v20, %v186_v19 }
  0xab   : > { %v189_v22 = vrot.slane %v188_v21, 1 }
  0xad   : > { %v190_v24 = vadd.f32 %v189_v22, %v188_v21 }
  0xaf   : > { %v191_v25 = vadd.f32 %v190_v24, %v158_v23 }
  0xb1   : > { %193 = vst.msk [vmem:[#allocation2] sm:$0x1] %vm154_vm0, %v191_v25 }
  0xb8   : > { %v197_v26 = vld [vmem:[#allocation2] sm:$0x1] }
  0xb9   : > { %198 = vst.msk [vmem:[%s149_s6] sm:$0x1] %vm154_vm0, %v197_v26 }
  0xba PF: > { %s14_s11 = sadd.s32 1, %s417_s11   ;;  %s525_s6 = smov %s401_s7 }
  0xbb   : > { %p11_p0 = scmp.ge.s32.totalorder %s14_s11, 4   ;;  %s526_s7 = smov %s405_s8 }
  0xbc   : > { %s527_s8 = smov %s479_s18  ;;  %s528_s9 = smov %s413_s10 }
  0xbd   : > { %s529_s10 = smov %s531_s13  ;;  %13 = sbr.rel (!%p11_p0) target bundleno = 4 (0x4), region = 73 }
  0xc2   :  { %216 = vsyncpa [#allocation4], 1 }
  0xc3   :  { %218 = vsyncpa [#allocation4 + $0x1], 1 }

</bundles_post_ra>
